<compile_context>
chip_gen: v7x
topology: tpu7x:2x2x1
jax: 0.10.0
libtpu: 0.0.40
codegen_flags: <defaults>
</compile_context>

<pallas_src>
import functools

import jax
import jax.numpy as jnp
from jax.experimental import pallas as pl
from jax.experimental.pallas import tpu as pltpu


def _round_up(v, m):
    return ((v + m - 1) // m) * m


def _classify(din, dout):
    """Pick the execution unit for a layer (static, by shape)."""
    if din <= 4:
        return "vpu_k"   # tiny contraction dim: broadcast multiply-adds on the VPU
    if dout == 1:
        return "vpu_n"   # single output feature: elementwise mul + sublane reduce
    return "mxu"         # real matmul


def _slab_dims(layer_dims):
    """Rows/cols of the packed per-layer parameter slab (padded to (8,128))."""
    rows, cols = 8, 2
    for din, dout in layer_dims:
        kind = _classify(din, dout)
        if kind == "vpu_n":
            rows = max(rows, din)
            cols = max(cols, 2)
        else:
            rows = max(rows, dout)
            cols = max(cols, din + 1)
    return _round_up(rows, 8), _round_up(cols, 128)


def _pack_params(params, rows, cols):
    """Pack all (W, b) into one [L, rows, cols] f32 slab (single resident DMA)."""
    num_layers = len(params)
    slab = jnp.zeros((num_layers, rows, cols), jnp.float32)
    for l, (w, b) in enumerate(params):
        din, dout = w.shape
        kind = _classify(din, dout)
        if kind == "vpu_n":
            # store W as a column [din, 1], bias scalar at [0, 1]
            slab = slab.at[l, :din, 0:1].set(w.astype(jnp.float32))
            slab = slab.at[l, 0:1, 1:2].set(b.reshape(1, 1).astype(jnp.float32))
        else:
            # store W^T [dout, din], bias column right after it
            slab = slab.at[l, :dout, :din].set(w.T.astype(jnp.float32))
            slab = slab.at[l, :dout, din:din + 1].set(
                b.reshape(dout, 1).astype(jnp.float32))
    return slab


def _feednet_kernel(layer_dims, x_ref, p_ref, o_ref):
    """Fused MLP forward on one batch tile.

    x_ref: [in_dim, TB]   (features on sublanes, batch on lanes)
    p_ref: [L, rows, cols] packed parameter slab (resident across grid steps)
    o_ref: [out_dim, TB]
    """
    num_layers = len(layer_dims)
    h = x_ref[...]                                   # [in_dim, TB] f32

    for l, (din, dout) in enumerate(layer_dims):
        pslab = p_ref[l]                             # [rows, cols] single tile load
        kind = _classify(din, dout)

        if kind == "vpu_k":
            # Tiny-K layer on the VPU: h_new = sum_k W^T[:, k] * h[k, :] + b
            w_t = pslab[:dout, :din]                 # [dout, din]
            b = pslab[:dout, din:din + 1]            # [dout, 1]
            z = w_t[:, 0:1] * h[0:1, :] + b          # [dout, TB]
            for k in range(1, din):
                z = z + w_t[:, k:k + 1] * h[k:k + 1, :]
            h = z
        elif kind == "vpu_n":
            # N=1 layer on VPU/XLU: elementwise multiply + sublane reduce
            w_col = pslab[:din, 0:1]                 # [din, 1]
            b = pslab[0:1, 1:2]                      # [1, 1]
            h = jnp.sum(w_col * h, axis=0, keepdims=True) + b   # [1, TB]
        else:
            # Hidden square matmul on the MXU, f32 accumulation
            w_t = pslab[:dout, :din]                 # [dout, din]
            b = pslab[:dout, din:din + 1]            # [dout, 1]
            h = jnp.dot(w_t, h, preferred_element_type=jnp.float32) + b

        if l < num_layers - 1:
            h = jnp.tanh(h)                          # EUP

    o_ref[...] = h.astype(o_ref.dtype)


def feednet_forward(x, params, *, batch_tile=1024):
    """x: [B, 2] float32. params: list of (W [in, out], b [1, out]) per layer."""
    batch, in_dim = x.shape
    out_dim = params[-1][0].shape[1]
    layer_dims = tuple((w.shape[0], w.shape[1]) for w, _ in params)
    num_layers = len(params)

    # Lane-dense batch tile (multiple of 128); shrink for toy batches.
    tb = batch_tile
    if batch <= tb:
        tb = max(128, _round_up(batch, 128))
    b_pad = _round_up(batch, tb)

    # Transpose to features-on-sublane / batch-on-lane layout and zero-pad batch.
    x_t = jnp.zeros((in_dim, b_pad), jnp.float32).at[:, :batch].set(
        x.T.astype(jnp.float32))

    rows, cols = _slab_dims(layer_dims)
    slab = _pack_params(params, rows, cols)

    kernel = functools.partial(_feednet_kernel, layer_dims)

    flops = 2 * b_pad * sum(din * dout for din, dout in layer_dims)
    transcendentals = b_pad * sum(dout for _, dout in layer_dims[:-1])
    bytes_accessed = 4 * (in_dim * b_pad + out_dim * b_pad + slab.size)

    out_t = pl.pallas_call(
        kernel,
        out_shape=jax.ShapeDtypeStruct((out_dim, b_pad), jnp.float32),
        grid=(b_pad // tb,),
        in_specs=[
            # streamed batch tiles of x
            pl.BlockSpec((in_dim, tb), lambda i: (0, i)),
            # packed parameter slab: constant index -> stays VMEM-resident
            pl.BlockSpec((num_layers, rows, cols), lambda i: (0, 0, 0)),
        ],
        out_specs=pl.BlockSpec((out_dim, tb), lambda i: (0, i)),
        compiler_params=pltpu.CompilerParams(
            dimension_semantics=("parallel",)),
        cost_estimate=pl.CostEstimate(
            flops=flops,
            transcendentals=transcendentals,
            bytes_accessed=bytes_accessed),
    )(x_t, slab)

    # Back to the PyTorch-facing [B, out_dim] layout; drop batch padding.
    return out_t[:, :batch].T


def init_feednet_params(key, hidden_layers, input_size=2, output_size=1):
    """Deterministic init mimicking PyTorch nn.Linear default (U[-1/sqrt(fan_in), +])."""
    sizes = [input_size] + list(hidden_layers) + [output_size]
    params = []
    for i in range(len(sizes) - 1):
        fan_in, fan_out = sizes[i], sizes[i + 1]
        key, kw, kb = jax.random.split(key, 3)
        bound = 1.0 / jnp.sqrt(jnp.float32(fan_in))
        w = jax.random.uniform(kw, (fan_in, fan_out), jnp.float32, -bound, bound)
        b = jax.random.uniform(kb, (1, fan_out), jnp.float32, -bound, bound)
        params.append((w, b))
    return params


def feednet_reference(x, params):
    """Pure-JAX reference of FeedNet.forward for correctness checking."""
    h = x
    for i, (w, b) in enumerate(params):
        h = h @ w + b
        if i < len(params) - 1:
            h = jnp.tanh(h)
    return h


if __name__ == "__main__":
    key = jax.random.PRNGKey(0)
    k_params, k_x = jax.random.split(key)

    hidden_layers = [32, 32]   # FeedNet(hidden_layers=[32, 32])
    batch = 8

    params = init_feednet_params(k_params, hidden_layers)
    x = jax.random.normal(k_x, (batch, 2), dtype=jnp.float32)

    out = feednet_forward(x, params)
    out = jax.block_until_ready(out)

    ref = feednet_reference(x, params)
    assert out.shape == (batch, 1), out.shape
    assert jnp.allclose(out, ref, atol=1e-5, rtol=1e-5), "mismatch vs reference"

    print("KERNEL_OK")
</pallas_src>

<mosaic_0001>
module attributes {stable_mosaic.version = 11 : i64} {
  func.func @_feednet_kernel(%arg0: i32, %arg1: memref<2x128xf32, #tpu.memory_space<vmem>>, %arg2: memref<3x32x128xf32, #tpu.memory_space<vmem>>, %arg3: memref<1x128xf32, #tpu.memory_space<vmem>>) attributes {dimension_semantics = [#tpu.dimension_semantics<parallel>], iteration_bounds = array<i64: 1>, scalar_prefetch = 0 : i64, scratch_operands = 0 : i64, tpu.core_type = #tpu.core_type<tc>, window_params = [{transform_indices = @transform_0, window_bounds = array<i64: 2, 128>}, {pipeline_mode = #tpu.pipeline_mode<synchronous>, transform_indices = @transform_1, window_bounds = array<i64: 3, 32, 128>}, {transform_indices = @transform_2, window_bounds = array<i64: 1, 128>}]} {
    %c0 = arith.constant 0 : index
    %c0_0 = arith.constant 0 : index
    %0 = vector.load %arg1[%c0, %c0_0] : memref<2x128xf32, #tpu.memory_space<vmem>>, vector<2x128xf32>
    %c0_1 = arith.constant 0 : index
    %c0_2 = arith.constant 0 : index
    %c0_3 = arith.constant 0 : index
    %1 = vector.load %arg2[%c0_1, %c0_2, %c0_3] : memref<3x32x128xf32, #tpu.memory_space<vmem>>, vector<1x32x128xf32>
    %2 = vector.shape_cast %1 : vector<1x32x128xf32> to vector<32x128xf32>
    %3 = vector.extract_strided_slice %2 {offsets = [0, 0], sizes = [32, 2], strides = [1, 1]} : vector<32x128xf32> to vector<32x2xf32>
    %4 = vector.extract_strided_slice %2 {offsets = [0, 2], sizes = [32, 1], strides = [1, 1]} : vector<32x128xf32> to vector<32x1xf32>
    %5 = vector.extract_strided_slice %3 {offsets = [0, 0], sizes = [32, 1], strides = [1, 1]} : vector<32x2xf32> to vector<32x1xf32>
    %6 = vector.extract_strided_slice %0 {offsets = [0, 0], sizes = [1, 128], strides = [1, 1]} : vector<2x128xf32> to vector<1x128xf32>
    %7 = vector.broadcast %5 : vector<32x1xf32> to vector<32x128xf32>
    %8 = vector.broadcast %6 : vector<1x128xf32> to vector<32x128xf32>
    %9 = arith.mulf %7, %8 : vector<32x128xf32>
    %10 = vector.broadcast %4 : vector<32x1xf32> to vector<32x128xf32>
    %11 = arith.addf %9, %10 : vector<32x128xf32>
    %12 = vector.extract_strided_slice %3 {offsets = [0, 1], sizes = [32, 1], strides = [1, 1]} : vector<32x2xf32> to vector<32x1xf32>
    %13 = vector.extract_strided_slice %0 {offsets = [1, 0], sizes = [1, 128], strides = [1, 1]} : vector<2x128xf32> to vector<1x128xf32>
    %14 = vector.broadcast %12 : vector<32x1xf32> to vector<32x128xf32>
    %15 = vector.broadcast %13 : vector<1x128xf32> to vector<32x128xf32>
    %16 = arith.mulf %14, %15 : vector<32x128xf32>
    %17 = arith.addf %11, %16 : vector<32x128xf32>
    %18 = math.tanh %17 : vector<32x128xf32>
    %c1 = arith.constant 1 : index
    %c0_4 = arith.constant 0 : index
    %c0_5 = arith.constant 0 : index
    %19 = vector.load %arg2[%c1, %c0_4, %c0_5] : memref<3x32x128xf32, #tpu.memory_space<vmem>>, vector<1x32x128xf32>
    %20 = vector.shape_cast %19 : vector<1x32x128xf32> to vector<32x128xf32>
    %21 = vector.extract_strided_slice %20 {offsets = [0, 0], sizes = [32, 32], strides = [1, 1]} : vector<32x128xf32> to vector<32x32xf32>
    %22 = vector.extract_strided_slice %20 {offsets = [0, 32], sizes = [32, 1], strides = [1, 1]} : vector<32x128xf32> to vector<32x1xf32>
    %cst = arith.constant dense<0.000000e+00> : vector<32x128xf32>
    %23 = tpu.matmul %21, %18, %cst {dimension_numbers = #tpu.dot_dimension_numbers<[1], [0], [0], [1], [0, 0, 1, 1], [], []>} : vector<32x32xf32>, vector<32x128xf32>, vector<32x128xf32> -> vector<32x128xf32>
    %24 = vector.broadcast %22 : vector<32x1xf32> to vector<32x128xf32>
    %25 = arith.addf %23, %24 : vector<32x128xf32>
    %26 = math.tanh %25 : vector<32x128xf32>
    %c2 = arith.constant 2 : index
    %c0_6 = arith.constant 0 : index
    %c0_7 = arith.constant 0 : index
    %27 = vector.load %arg2[%c2, %c0_6, %c0_7] : memref<3x32x128xf32, #tpu.memory_space<vmem>>, vector<1x32x128xf32>
    %28 = vector.shape_cast %27 : vector<1x32x128xf32> to vector<32x128xf32>
    %29 = vector.extract_strided_slice %28 {offsets = [0, 0], sizes = [32, 1], strides = [1, 1]} : vector<32x128xf32> to vector<32x1xf32>
    %30 = vector.extract_strided_slice %28 {offsets = [0, 1], sizes = [1, 1], strides = [1, 1]} : vector<32x128xf32> to vector<1x1xf32>
    %31 = vector.broadcast %29 : vector<32x1xf32> to vector<32x128xf32>
    %32 = arith.mulf %31, %26 : vector<32x128xf32>
    %cst_8 = arith.constant dense<0.000000e+00> : vector<128xf32>
    %33 = vector.multi_reduction <add>, %32, %cst_8 [0] : vector<32x128xf32> to vector<128xf32>
    %34 = vector.shape_cast %33 : vector<128xf32> to vector<1x128xf32>
    %35 = vector.broadcast %30 : vector<1x1xf32> to vector<1x128xf32>
    %36 = arith.addf %34, %35 : vector<1x128xf32>
    %c0_9 = arith.constant 0 : index
    %c0_10 = arith.constant 0 : index
    %37 = vector.load %arg3[%c0_9, %c0_10] : memref<1x128xf32, #tpu.memory_space<vmem>>, vector<1x128xf32>
    tpu.vector_store %arg3[%c0_9, %c0_10], %36 {strides = array<i32>} : memref<1x128xf32, #tpu.memory_space<vmem>>, vector<1x128xf32>,
    return
  }
  func.func @transform_0(%arg0: i32) -> (i32, i32) {
    %c0_i32 = arith.constant 0 : i32
    %c0_i32_0 = arith.constant 0 : i32
    return %c0_i32, %arg0 : i32, i32
  }
  func.func @transform_1(%arg0: i32) -> (i32, i32, i32) {
    %c0_i32 = arith.constant 0 : i32
    %c0_i32_0 = arith.constant 0 : i32
    %c0_i32_1 = arith.constant 0 : i32
    %c0_i32_2 = arith.constant 0 : i32
    return %c0_i32, %c0_i32_0, %c0_i32_1 : i32, i32, i32
  }
  func.func @transform_2(%arg0: i32) -> (i32, i32) {
    %c0_i32 = arith.constant 0 : i32
    %c0_i32_0 = arith.constant 0 : i32
    return %c0_i32, %arg0 : i32, i32
  }
}

</mosaic_0001>

<bundles_post_ra>
// kernel: tpu_custom_call.1
= control target key start
LH: loop header
LB: loop body
LE: loop exit
PB: predicated region body
PF: predicated region fallthrough
CT: control target
= control target key end

     0   :  { %7 = vsyncpa [#allocation3], 0  ;;  %s533_s0 = inlined_call_operand.hbm [shape: f32[2,128], index: 0, kind: input, shape index: {}]   ;;  %s534_s1 = inlined_call_operand.hbm [shape: f32[3,32,128], index: 1, kind: input, shape index: {}]   ;;  %s535_s2 = inlined_call_operand.hbm [shape: f32[1,128], index: 2, kind: output, shape index: {}]  }
   0x1   :  { %8 = vsyncpa [#allocation6], 0 }
   0x2   :  { %9 = vsyncpa [#allocation4], 0  ;;  %s454_s9 = smov [#allocation2]   ;;  %s455_s11 = smov [#allocation5]  }
   0x3   :  { %s16_s10 = sshll.u32 %s454_s9, 4  ;;  %s25_s12 = sshll.u32 %s455_s11, 4  ;;  %s17_s10 = int_to_ptr.vmem [resolvable:$true] %s16_s10  ;;  %s478_s12 = int_to_ptr.vmem [resolvable:$true] %s25_s12 }
   0x4   :  { %s382_s15 = scalar_lea.hbm %s533_s0, 32 }
   0x5   :  { %p383_p0 = scmp.ne.s32.totalorder %s533_s0, %s382_s15  ;;  %p386_p1 = scmp.lt.u32.totalorder %s382_s15, %s533_s0 }
   0x7   :  { %p388_p2 = pnand %p386_p1, %p383_p0 }
   0x9   :  { %391 = shalt.err (!%p388_p2)
}
   0xa   :  { %s392_s20 = scalar_lea.vmem %s17_s10, 32  ;;  %p397_p4 = scmp.lt.s32.totalorder %s17_s10, %s17_s10 }
   0xb   :  { %p393_p3 = scmp.ne.s32.totalorder %s17_s10, %s392_s20  ;;  %p398_p5 = scmp.lt.s32.totalorder %s392_s20, %s392_s20 }
   0xd   :  { %p399_p6 = por %p398_p5, %p397_p4 }
   0xf   :  { %p400_p7 = pnand %p399_p6, %p393_p3 }
  0x11   :  { %403 = shalt.err (!%p400_p7)
}
  0x12   :  { %19 = dma.hbm_to_vmem [thread:$0]  %s533_s0, 32, %s17_s10, [#allocation3]  }
  0x13   :  { %s404_s25 = scalar_lea.hbm %s534_s1, 1536 }
  0x14   :  { %p405_p8 = scmp.ne.s32.totalorder %s534_s1, %s404_s25  ;;  %p408_p9 = scmp.lt.u32.totalorder %s404_s25, %s534_s1 }
  0x16   :  { %p410_p10 = pnand %p408_p9, %p405_p8 }
  0x18   :  { %413 = shalt.err (!%p410_p10)
}
  0x19   :  { %s414_s30 = scalar_lea.vmem %s478_s12, 1536  ;;  %p419_p12 = scmp.lt.s32.totalorder %s478_s12, %s478_s12 }
  0x1a   :  { %p415_p11 = scmp.ne.s32.totalorder %s478_s12, %s414_s30  ;;  %p420_p13 = scmp.lt.s32.totalorder %s414_s30, %s414_s30 }
  0x1c   :  { %p421_p0 = por %p420_p13, %p419_p12 }
  0x1e   :  { %p422_p1 = pnand %p421_p0, %p415_p11 }
  0x20   :  { %425 = shalt.err (!%p422_p1)
}
  0x21   :  { %s456_s0 = smov 128   ;;  %s457_s3 = smov 8  }
  0x22   :  { %31 = dma.hbm_to_vmem [thread:$0]  %s534_s1, 1536, %s478_s12, [#allocation6], %s456_s0, %s456_s0, %s457_s3  }
  0x23   :  { %448 = dma.done.wait [#allocation3], 32  }
  0x24   :  { %449 = vsyncadd [#allocation3], 4294967264 }
  0x25   :  { %450 = dma.done.wait [#allocation6], 1536  }
  0x26   :  { %451 = vsyncadd [#allocation6], 4294965760  ;;  %v458_v0 = vmov 2   ;;  %v459_v1 = vmov 0   ;;  %v39_v2 = vld [vmem:[#allocation5] sm:$0xff]  ;;  %v40_v3 = vld [vmem:[#allocation5 + $0x8] sm:$0xff]  ;;  %v63_v16 = vlaneseq }
  0x27   :  { %354 = vset.pattern.permute.xlu1 %v458_v0  ;;  %353 = vset.pattern.permute.xlu0 %v459_v1  ;;  %v42_v4 = vld [vmem:[#allocation5 + $0x18] sm:$0xff]  ;;  %v460_v5 = vmov 1   ;;  %v41_v6 = vld [vmem:[#allocation5 + $0x10] sm:$0xff]  ;;  %v124_v7 = vld [vmem:[#allocation5 + $0x20] sm:$0xff]  ;;  %vm148_vm0 = vcmask 261120   ;;  %v461_v10 = vmov 32  }
  0x28   :  { %72 = vperm.xlu1 %354, %v39_v2   ;;  %45 = vperm.xlu0 %353, %v39_v2   ;;  %v126_v8 = vld [vmem:[#allocation5 + $0x30] sm:$0xff]  ;;  %v511_v9 = vld [vmem:[#allocation5 + $0x28] sm:$0xff]  ;;  %v247_v11 = vld [vmem:[#allocation5 + $0x40] sm:$0xff]  ;;  %v64_v17 = vshrl.u32 %v63_v16, 7  ;;  %s462_s1 = smov [#allocation7]  }
  0x29   :  { %326 = vmatprep.mubr.msk.f32.mxu0 %vm148_vm0, %v124_v7  ;;  %329 = vmatprep.mubr.msk.f32.mxu1 %vm148_vm0, %v126_v8  ;;  %v250_v12 = vld [vmem:[#allocation5 + $0x58] sm:$0xff]  ;;  %v248_v14 = vld [vmem:[#allocation5 + $0x48] sm:$0xff]  ;;  %v249_v15 = vld [vmem:[#allocation5 + $0x50] sm:$0xff]  ;;  %s296_s6 = sshll.u32 %s462_s1, 4  ;;  %s297_s6 = int_to_ptr.vmem [resolvable:$true] %s296_s6 }
  0x2a   :  { %v514_v13 = vld [vmem:[#allocation5 + $0x38] sm:$0xff]  ;;  %v65_v20 = vsub.s32 0, %v64_v17  ;;  %v109_v22 = vsub.s32 1, %v64_v17  ;;  %s426_s7 = scalar_lea.vmem %s297_s6, 16  ;;  %s430_s8 = scalar_lea.vmem %s297_s6, 32 }
  0x2b   :  { %v38_v21 = vld [vmem:[#allocation2] sm:$0x3]  ;;  %p427_p2 = scmp.ne.s32.totalorder %s297_s6, %s426_s7  ;;  %p431_p3 = scmp.lt.s32.totalorder %s297_s6, %s297_s6 }
  0x2c   :  { %76 = vperm.xlu1 %354, %v40_v3   ;;  %50 = vperm.xlu0 %353, %v40_v3   ;;  %v66_v25 = vrot.slane %v38_v21, %v65_v20  ;;  %v110_v26 = vrot.slane %v38_v21, %v109_v22  ;;  %p432_p4 = scmp.lt.s32.totalorder %s430_s8, %s426_s7 }
  0x2e   :  { %p433_p5 = por %p432_p4, %p431_p3 }
  0x30   :  { %355 = vset.pattern.permute.xlu1 %v460_v5  ;;  %60 = vperm.xlu0 %353, %v42_v4   ;;  %p434_p6 = pnand %p433_p5, %p427_p2 }
  0x31   :  { %96 = vperm.xlu1 %355, %v40_v3  }
  0x34   :  { %357 = vset.pattern.permute.xlu0 %v460_v5 }
  0x35   :  { %356 = vset.pattern.permute.xlu1 %v459_v1  ;;  %92 = vperm.xlu0 %357, %v39_v2  }
  0x36   :  { %55 = vperm.xlu1 %356, %v41_v6  }
  0x39   :  { %100 = vperm.xlu0 %357, %v41_v6  }
  0x3a   :  { %358 = vset.pattern.permute.xlu1 %v458_v0 }
  0x3b   :  { %80 = vperm.xlu1 %358, %v41_v6  }
  0x3d   :  { %361 = vset.pattern.permute.xlu0 %v461_v10 }
  0x3e   :  { %135 = vperm.xlu0 %361, %v511_v9  }
  0x3f   :  { %84 = vperm.xlu1 %358, %v42_v4  }
  0x42   :  { %362 = vset.pattern.permute.xlu0 %v459_v1 }
  0x43   :  { %359 = vset.pattern.permute.xlu1 %v460_v5  ;;  %253 = vperm.xlu0 %362, %v247_v11  }
  0x44   :  { %104 = vperm.xlu1 %359, %v42_v4  }
  0x47   :  { %268 = vperm.xlu0 %362, %v250_v12  }
  0x48   :  { %360 = vset.pattern.permute.xlu1 %v461_v10 }
  0x49   :  { %130 = vperm.xlu1 %360, %v124_v7  }
  0x4b   :  { %365 = vset.pattern.permute.xlu0 %v460_v5 }
  0x4d   :  { %140 = vperm.xlu1 %360, %v126_v8  }
  0x51   :  { %145 = vperm.xlu1 %360, %v514_v13  }
  0x55   :  { %363 = vset.pattern.permute.xlu1 %v459_v1 }
  0x56   :  { %258 = vperm.xlu1 %363, %v248_v14  }
  0x5a   :  { %263 = vperm.xlu1 %363, %v249_v15  }
  0x5e   :  { %364 = vset.pattern.permute.xlu1 %v460_v5 }
  0x5f   :  { %285 = vperm.xlu1 %364, %v247_v11  }
  0xa7   :  { %v73_v18 = vpop.permute.xlu1 %72  ;;  %v46_v19 = vpop.permute.xlu0 %45 }
  0xa8   :  { %v67_v30 = vmul.f32 %v66_v25, %v46_v19 }
  0xaa   :  { %v87_v35 = vadd.f32 %v73_v18, %v67_v30 }
  0xab   :  { %v77_v23 = vpop.permute.xlu1 %76  ;;  %v51_v24 = vpop.permute.xlu0 %50 }
  0xac   :  { %v68_v27 = vmul.f32 %v66_v25, %v51_v24 }
  0xae   :  { %v88_v32 = vadd.f32 %v77_v23, %v68_v27 }
  0xaf   :  { %v61_v28 = vpop.permute.xlu0 %60 }
  0xb0   :  { %v97_v29 = vpop.permute.xlu1 %96  ;;  %v70_v46 = vmul.f32 %v66_v25, %v61_v28 }
  0xb1   :  { %v112_v31 = vmul.f32 %v110_v26, %v97_v29 }
  0xb3   :  { %v116_v33 = vadd.f32 %v112_v31, %v88_v32 }
  0xb4   :  { %v93_v34 = vpop.permute.xlu0 %92 }
  0xb5   :  { %v111_v36 = vmul.f32 %v110_v26, %v93_v34  ;;  %v56_v37 = vpop.permute.xlu1 %55  ;;  %366 = vtanh.f32 %v116_v33 }
  0xb6   :  { %v69_v41 = vmul.f32 %v66_v25, %v56_v37 }
  0xb7   :  { %v115_v38 = vadd.f32 %v111_v36, %v87_v35 }
  0xb8   :  { %v101_v40 = vpop.permute.xlu0 %100 }
  0xb9   :  { %368 = vtanh.f32 %v115_v38  ;;  %v113_v44 = vmul.f32 %v110_v26, %v101_v40 }
  0xba   :  { %v81_v39 = vpop.permute.xlu1 %80 }
  0xbb   :  { %v89_v43 = vadd.f32 %v81_v39, %v69_v41 }
  0xbd   :  { %v117_v48 = vadd.f32 %v113_v44, %v89_v43  ;;  %v136_v59 = vpop.permute.xlu0 %135 }
  0xbe   :  { %v85_v42 = vpop.permute.xlu1 %84 }
  0xbf   :  { %v367_v45 = vpop.eup %366  ;;  %v90_v50 = vadd.f32 %v85_v42, %v70_v46  ;;  %370 = vtanh.f32 %v117_v48 }
  0xc2   :  { %v254_v6 = vpop.permute.xlu0 %253 }
  0xc3   :  { %v369_v47 = vpop.eup %368  ;;  %v105_v49 = vpop.permute.xlu1 %104 }
  0xc4   :  { %v114_v51 = vmul.f32 %v110_v26, %v105_v49  ;;  %v332_v52 = vpack.c.bf16 %v367_v45, %v369_v47 }
  0xc6   :  { %v118_v53 = vadd.f32 %v114_v51, %v90_v50  ;;  %333 = vmatprep.subr.bf16.mxu0 %v332_v52  ;;  %340 = vmatprep.subr.bf16.mxu1 %v332_v52  ;;  %v269_v14 = vpop.permute.xlu0 %268 }
  0xc7   :  { %335 = vmatpush3.bf16.msra.mxu0 %v332_v52  ;;  %342 = vmatpush3.bf16.msra.mxu1 %v332_v52 }
  0xc8   :  { %372 = vtanh.f32 %v118_v53  ;;  %v131_v57 = vpop.permute.xlu1 %130 }
  0xc9   :  { %v371_v54 = vpop.eup %370 }
  0xcc   :  { %v141_v58 = vpop.permute.xlu1 %140 }
  0xd0   :  { %v146_v1 = vpop.permute.xlu1 %145 }
  0xd2   :  { %v373_v55 = vpop.eup %372 }
  0xd3   :  { %v336_v56 = vpack.c.bf16 %v373_v55, %v371_v54 }
  0xd5   :  { %337 = vmatprep.subr.bf16.mxu0 %v336_v56  ;;  %341 = vmatprep.subr.bf16.mxu1 %v336_v56  ;;  %v259_v5 = vpop.permute.xlu1 %258 }
  0xd6   :  { %339 = vmatpush3.bf16.msra.mxu0 %v336_v56  ;;  %343 = vmatpush3.bf16.msra.mxu1 %v336_v56 }
  0xd9   :  { %327 = vmatmul.mubr.msk.f32.vlgmr.msra.gmra.mrb[0].mxu0 %vm148_vm0, %v511_v9  ;;  %330 = vmatmul.mubr.msk.f32.vlgmr.msra.gmra.mrb[0].mxu1 %vm148_vm0, %v514_v13  ;;  %v264_v13 = vpop.permute.xlu1 %263 }
  0xde   :  { %v286_v25 = vpop.permute.xlu1 %285 }
 0x1ac   :  { %v328_v60 = vpop.f32.mrb[0].mxu0  ;;  %v331_v61 = vpop.f32.mrb[0].mxu1 }
 0x1ad   :  { %v229_v62 = vadd.f32 %v328_v60, %v136_v59  ;;  %v223_v63 = vpop.f32.mrb[1].mxu0  ;;  %v233_v0 = vpop.f32.mrb[1].mxu1  ;;  %v239_v4 = vadd.f32 %v331_v61, %v146_v1 }
 0x1ae   :  { %v224_v2 = vadd.f32 %v223_v63, %v131_v57  ;;  %v234_v3 = vadd.f32 %v233_v0, %v141_v58 }
 0x1af   :  { %374 = vtanh.f32 %v229_v62 }
 0x1b0   :  { %376 = vtanh.f32 %v224_v2 }
 0x1b1   :  { %378 = vtanh.f32 %v234_v3 }
 0x1b2   :  { %380 = vtanh.f32 %v239_v4 }
 0x1b9   :  { %v375_v7 = vpop.eup %374 }
 0x1ba   :  { %v272_v8 = vmul.f32 %v375_v7, %v259_v5  ;;  %v377_v9 = vpop.eup %376 }
 0x1bb   :  { %v379_v10 = vpop.eup %378  ;;  %v271_v11 = vmul.f32 %v377_v9, %v254_v6 }
 0x1bc   :  { %v381_v12 = vpop.eup %380  ;;  %v273_v16 = vmul.f32 %v379_v10, %v264_v13 }
 0x1bd   :  { %v275_v15 = vadd.f32 %v272_v8, %v271_v11  ;;  %v274_v18 = vmul.f32 %v381_v12, %v269_v14 }
 0x1bf   :  { %v276_v17 = vadd.f32 %v275_v15, %v273_v16 }
 0x1c1   :  { %v277_v19 = vadd.f32 %v276_v17, %v274_v18 }
 0x1c3   :  { %v278_v20 = vrot.slane %v277_v19, 4 }
 0x1c5   :  { %v279_v21 = vadd.f32 %v278_v20, %v277_v19 }
 0x1c7   :  { %v280_v22 = vrot.slane %v279_v21, 2 }
 0x1c9   :  { %v281_v23 = vadd.f32 %v280_v22, %v279_v21 }
 0x1cb   :  { %v282_v24 = vrot.slane %v281_v23, 1 }
 0x1cd   :  { %v283_v26 = vadd.f32 %v282_v24, %v281_v23 }
 0x1cf   :  { %v288_v27 = vadd.f32 %v286_v25, %v283_v26 }
 0x1d1   :  { %289 = vst [vmem:[#allocation7] sm:$0x1] %v288_v27 }
 0x1d2   :  { %437 = shalt.err (!%p434_p6)
}
 0x1d3   :  { %s438_s11 = scalar_lea.hbm %s535_s2, 16 }
 0x1d4   :  { %p439_p7 = scmp.ne.s32.totalorder %s535_s2, %s438_s11  ;;  %p442_p8 = scmp.lt.u32.totalorder %s438_s11, %s535_s2 }
 0x1d6   :  { %p444_p9 = pnand %p442_p8, %p439_p7 }
 0x1d8   :  { %447 = shalt.err (!%p444_p9)
}
 0x1d9   :  { %299 = dma.vmem_to_hbm [thread:$0]  %s297_s6, 16, %s535_s2, [#allocation4]  }
 0x1da   :  { %452 = dma.done.wait [#allocation4], 16  }
 0x1db   :  { %453 = vsyncadd [#allocation4], 4294967280 }
 0x1dc   :  { %303 = vsyncpa [#allocation3], 1 }
 0x1dd   :  { %304 = vsyncpa [#allocation6], 1 }
 0x1de   :  { %305 = vsyncpa [#allocation4], 1 }

</bundles_post_ra>
